<compile_context>
chip_gen: v7x
topology: tpu7x:2x2x1
jax: 0.10.0
libtpu: 0.0.40
codegen_flags: <defaults>
</compile_context>

<pallas_src>
import functools

import jax
import jax.numpy as jnp
from jax.experimental import pallas as pl
from jax.experimental.pallas import tpu as pltpu


def _linear_relu_kernel(x_ref, w_ref, b_ref, o_ref):
    # x_ref: (tm, K)  w_ref: (K, tn)  b_ref: (1, tn)  o_ref: (tm, tn)
    y = jnp.dot(x_ref[...], w_ref[...], preferred_element_type=jnp.float32)
    y = y + b_ref[...]            # bias broadcast, f32
    y = jnp.maximum(y, 0.0)       # ReLU (VPU), f32
    o_ref[...] = y.astype(o_ref.dtype)


def _linear_relu_dropout_kernel(x_ref, w_ref, b_ref, bits_ref, o_ref, *,
                                threshold, scale):
    y = jnp.dot(x_ref[...], w_ref[...], preferred_element_type=jnp.float32)
    y = y + b_ref[...]
    y = jnp.maximum(y, 0.0)
    # Inverted dropout via integer threshold: keep with prob (1 - p).
    keep = bits_ref[...] >= jnp.uint32(threshold)
    y = jnp.where(keep, y * jnp.float32(scale), jnp.float32(0.0))
    o_ref[...] = y.astype(o_ref.dtype)


def _round_up(a, m):
    return (a + m - 1) // m * m


def base_block_forward(x, w, b, *, p=0.1, training=False, dropout_bits=None,
                       rng_key=None, use_bf16_matmul=False,
                       tile_m=256, tile_n=512):
    """y = Dropout(ReLU(x @ w.T + b)).  x: (B, K), w: (N, K), b: (N,)."""
    B, K = x.shape
    N, K2 = w.shape
    assert K == K2, "in_features mismatch"
    out_dtype = x.dtype

    # Pre-transpose the weight once, outside the kernel (no in-kernel w.T).
    wt = jnp.asarray(w).T                                  # [K, N]

    compute_dtype = jnp.bfloat16 if use_bf16_matmul else x.dtype
    xq = x.astype(compute_dtype)
    wq = wt.astype(compute_dtype)
    b2d = b.astype(jnp.float32).reshape(1, N)              # epilogue stays f32

    # Tile sizes: sublane-aligned rows, lane-dense (multiple of 128) columns.
    tm = min(tile_m, _round_up(B, 8))
    tn = min(tile_n, _round_up(N, 128))
    Bp = _round_up(B, tm)
    Np = _round_up(N, tn)

    # Zero-pad; ReLU/dropout keep the padded region at zero, sliced off below.
    xq = jnp.pad(xq, ((0, Bp - B), (0, 0)))
    wq = jnp.pad(wq, ((0, 0), (0, Np - N)))
    b2d = jnp.pad(b2d, ((0, 0), (0, Np - N)))

    # N-tiles outer, B-tiles inner: the weight tile (depends only on j) stays
    # resident across the inner batch loop; only x and out re-DMA.
    grid = (Np // tn, Bp // tm)

    in_specs = [
        pl.BlockSpec((tm, K), lambda j, i: (i, 0)),        # x tile
        pl.BlockSpec((K, tn), lambda j, i: (0, j)),        # weight tile (resident over i)
        pl.BlockSpec((1, tn), lambda j, i: (0, j)),        # bias tile
    ]
    inputs = [xq, wq, b2d]

    apply_dropout = training and p > 0.0
    if apply_dropout:
        if dropout_bits is None:
            if rng_key is None:
                raise ValueError("training-mode dropout needs dropout_bits or rng_key")
            dropout_bits = jax.random.bits(rng_key, (B, N), dtype=jnp.uint32)
        bits = jnp.pad(dropout_bits, ((0, Bp - B), (0, Np - N)))
        in_specs.append(pl.BlockSpec((tm, tn), lambda j, i: (i, j)))
        inputs.append(bits)
        threshold = min(int(round(p * (2 ** 32))), 2 ** 32 - 1)
        kernel = functools.partial(_linear_relu_dropout_kernel,
                                   threshold=threshold, scale=1.0 / (1.0 - p))
    else:
        kernel = _linear_relu_kernel

    # Explicit VMEM budget: double-buffered tile working set + slack,
    # kept well under v7x's 64 MiB physical VMEM.
    n_out_like = 2 if apply_dropout else 1
    vmem_est = 2 * 4 * (tm * K + K * tn + tn + tm * tn * n_out_like)
    vmem_limit = int(min(max(2 * vmem_est, 8 << 20), 48 << 20))

    out = pl.pallas_call(
        kernel,
        out_shape=jax.ShapeDtypeStruct((Bp, Np), out_dtype),
        grid=grid,
        in_specs=in_specs,
        out_specs=pl.BlockSpec((tm, tn), lambda j, i: (i, j)),
        compiler_params=pltpu.CompilerParams(
            dimension_semantics=("parallel", "parallel"),
            vmem_limit_bytes=vmem_limit,
        ),
    )(*inputs)
    return out[:B, :N]


if __name__ == "__main__":
    # Shapes implied by the module: Linear(in_features=32, out_features=32).
    batch, in_features, out_features = 8, 32, 32

    key = jax.random.PRNGKey(0)
    kx, kw, kb, kd = jax.random.split(key, 4)

    # Deterministic parameter init (mimics PyTorch uniform(-1/sqrt(K), 1/sqrt(K))).
    bound = 1.0 / (in_features ** 0.5)
    w = jax.random.uniform(kw, (out_features, in_features), jnp.float32,
                           minval=-bound, maxval=bound)
    b = jax.random.uniform(kb, (out_features,), jnp.float32,
                           minval=-bound, maxval=bound)
    x = jax.random.normal(kx, (batch, in_features), jnp.float32)

    # Reference (eval mode).
    y_ref = jnp.maximum(x @ w.T + b, 0.0)

    # 1) Eval mode, f32 matmul — exact check.
    y = jax.block_until_ready(base_block_forward(x, w, b, training=False))
    assert y.shape == (batch, out_features)
    assert jnp.allclose(y, y_ref, atol=1e-5, rtol=1e-5)

    # 2) Eval mode, bf16 MXU inputs with f32 accumulation (v6e/v7x fast path).
    y_bf16 = jax.block_until_ready(
        base_block_forward(x, w, b, training=False, use_bf16_matmul=True))
    assert jnp.allclose(y_bf16, y_ref, atol=1e-1, rtol=1e-1)

    # 3) Training mode: inverted dropout with an integer-threshold mask.
    #    Exact check against a JAX reference using the same random bits.
    p = 0.1
    bits = jax.random.bits(kd, (batch, out_features), dtype=jnp.uint32)
    y_train = jax.block_until_ready(
        base_block_forward(x, w, b, p=p, training=True, dropout_bits=bits))
    keep = bits >= jnp.uint32(int(round(p * (2 ** 32))))
    y_train_ref = jnp.where(keep, y_ref * (1.0 / (1.0 - p)), 0.0)
    assert y_train.shape == (batch, out_features)
    assert jnp.allclose(y_train, y_train_ref, atol=1e-5, rtol=1e-5)

    print("KERNEL_OK")
</pallas_src>

<mosaic_0001>
module attributes {stable_mosaic.version = 11 : i64} {
  func.func @_linear_relu_kernel(%arg0: i32, %arg1: i32, %arg2: memref<8x32xf32, #tpu.memory_space<vmem>>, %arg3: memref<32x128xf32, #tpu.memory_space<vmem>>, %arg4: memref<1x128xf32, #tpu.memory_space<vmem>>, %arg5: memref<8x128xf32, #tpu.memory_space<vmem>>) attributes {dimension_semantics = [#tpu.dimension_semantics<parallel>, #tpu.dimension_semantics<parallel>], iteration_bounds = array<i64: 1, 1>, scalar_prefetch = 0 : i64, scratch_operands = 0 : i64, tpu.core_type = #tpu.core_type<tc>, window_params = [{transform_indices = @transform_0, window_bounds = array<i64: 8, 32>}, {transform_indices = @transform_1, window_bounds = array<i64: 32, 128>}, {transform_indices = @transform_2, window_bounds = array<i64: 1, 128>}, {transform_indices = @transform_3, window_bounds = array<i64: 8, 128>}]} {
    %c0 = arith.constant 0 : index
    %c0_0 = arith.constant 0 : index
    %0 = vector.load %arg2[%c0, %c0_0] : memref<8x32xf32, #tpu.memory_space<vmem>>, vector<8x32xf32>
    %c0_1 = arith.constant 0 : index
    %c0_2 = arith.constant 0 : index
    %1 = vector.load %arg3[%c0_1, %c0_2] : memref<32x128xf32, #tpu.memory_space<vmem>>, vector<32x128xf32>
    %cst = arith.constant dense<0.000000e+00> : vector<8x128xf32>
    %2 = tpu.matmul %0, %1, %cst {dimension_numbers = #tpu.dot_dimension_numbers<[1], [0], [0], [1], [0, 0, 1, 1], [], []>} : vector<8x32xf32>, vector<32x128xf32>, vector<8x128xf32> -> vector<8x128xf32>
    %c0_3 = arith.constant 0 : index
    %c0_4 = arith.constant 0 : index
    %3 = vector.load %arg4[%c0_3, %c0_4] : memref<1x128xf32, #tpu.memory_space<vmem>>, vector<1x128xf32>
    %4 = vector.broadcast %3 : vector<1x128xf32> to vector<8x128xf32>
    %5 = arith.addf %2, %4 : vector<8x128xf32>
    %cst_5 = arith.constant 0.000000e+00 : f32
    %6 = vector.broadcast %cst_5 : f32 to vector<8x128xf32>
    %7 = arith.maximumf %5, %6 : vector<8x128xf32>
    %c0_6 = arith.constant 0 : index
    %c0_7 = arith.constant 0 : index
    %8 = vector.load %arg5[%c0_6, %c0_7] : memref<8x128xf32, #tpu.memory_space<vmem>>, vector<8x128xf32>
    tpu.vector_store %arg5[%c0_6, %c0_7], %7 {strides = array<i32>} : memref<8x128xf32, #tpu.memory_space<vmem>>, vector<8x128xf32>,
    return
  }
  func.func @transform_0(%arg0: i32, %arg1: i32) -> (i32, i32) {
    %c0_i32 = arith.constant 0 : i32
    %c0_i32_0 = arith.constant 0 : i32
    return %arg1, %c0_i32 : i32, i32
  }
  func.func @transform_1(%arg0: i32, %arg1: i32) -> (i32, i32) {
    %c0_i32 = arith.constant 0 : i32
    %c0_i32_0 = arith.constant 0 : i32
    return %c0_i32, %arg0 : i32, i32
  }
  func.func @transform_2(%arg0: i32, %arg1: i32) -> (i32, i32) {
    %c0_i32 = arith.constant 0 : i32
    %c0_i32_0 = arith.constant 0 : i32
    return %c0_i32, %arg0 : i32, i32
  }
  func.func @transform_3(%arg0: i32, %arg1: i32) -> (i32, i32) {
    %c0_i32 = arith.constant 0 : i32
    return %arg1, %arg0 : i32, i32
  }
}

</mosaic_0001>

<bundles_post_ra>
// kernel: tpu_custom_call.1
= control target key start
LH: loop header
LB: loop body
LE: loop exit
PB: predicated region body
PF: predicated region fallthrough
CT: control target
= control target key end

     0   :  { %8 = vsyncpa [#allocation3], 0  ;;  %s323_s0 = inlined_call_operand.hbm [shape: f32[8,32], index: 0, kind: input, shape index: {}]   ;;  %s324_s1 = inlined_call_operand.hbm [shape: f32[32,128], index: 1, kind: input, shape index: {}]   ;;  %s325_s2 = inlined_call_operand.vmem [shape: f32[1,128], index: 2, kind: input, shape index: {}]   ;;  %s326_s3 = inlined_call_operand.hbm [shape: f32[8,128], index: 3, kind: output, shape index: {}]  }
   0x1   :  { %9 = vsyncpa [#allocation6], 0 }
   0x2   :  { %10 = vsyncpa [#allocation4], 0  ;;  %s249_s12 = smov [#allocation2]   ;;  %s250_s14 = smov [#allocation5]  }
   0x3   :  { %s17_s13 = sshll.u32 %s249_s12, 4  ;;  %s26_s15 = sshll.u32 %s250_s14, 4  ;;  %s18_s13 = int_to_ptr.vmem [resolvable:$true] %s17_s13  ;;  %s277_s15 = int_to_ptr.vmem [resolvable:$true] %s26_s15 }
   0x4   :  { %s177_s18 = scalar_lea.hbm %s323_s0, 128 }
   0x5   :  { %p178_p0 = scmp.ne.s32.totalorder %s323_s0, %s177_s18  ;;  %p181_p1 = scmp.lt.u32.totalorder %s177_s18, %s323_s0 }
   0x7   :  { %p183_p2 = pnand %p181_p1, %p178_p0 }
   0x9   :  { %186 = shalt.err (!%p183_p2)
}
   0xa   :  { %s187_s23 = scalar_lea.vmem %s18_s13, 128  ;;  %p192_p4 = scmp.lt.s32.totalorder %s18_s13, %s18_s13 }
   0xb   :  { %p188_p3 = scmp.ne.s32.totalorder %s18_s13, %s187_s23  ;;  %p193_p5 = scmp.lt.s32.totalorder %s187_s23, %s187_s23 }
   0xd   :  { %p194_p6 = por %p193_p5, %p192_p4 }
   0xf   :  { %p195_p7 = pnand %p194_p6, %p188_p3 }
  0x11   :  { %198 = shalt.err (!%p195_p7)
}
  0x12   :  { %20 = dma.hbm_to_vmem [thread:$0]  %s323_s0, 128, %s18_s13, [#allocation3]  }
  0x13   :  { %s199_s28 = scalar_lea.hbm %s324_s1, 512 }
  0x14   :  { %p200_p8 = scmp.ne.s32.totalorder %s324_s1, %s199_s28  ;;  %p203_p9 = scmp.lt.u32.totalorder %s199_s28, %s324_s1 }
  0x16   :  { %p205_p10 = pnand %p203_p9, %p200_p8 }
  0x18   :  { %208 = shalt.err (!%p205_p10)
}
  0x19   :  { %s209_s6 = scalar_lea.vmem %s277_s15, 512  ;;  %p214_p12 = scmp.lt.s32.totalorder %s277_s15, %s277_s15 }
  0x1a   :  { %p210_p11 = scmp.ne.s32.totalorder %s277_s15, %s209_s6  ;;  %p215_p13 = scmp.lt.s32.totalorder %s209_s6, %s209_s6 }
  0x1c   :  { %p216_p0 = por %p215_p13, %p214_p12 }
  0x1e   :  { %p217_p1 = pnand %p216_p0, %p210_p11 }
  0x20   :  { %220 = shalt.err (!%p217_p1)
}
  0x21   :  { %s251_s0 = smov 128   ;;  %s252_s7 = smov 8  }
  0x22   :  { %32 = dma.hbm_to_vmem [thread:$0]  %s324_s1, 512, %s277_s15, [#allocation6], %s251_s0, %s251_s0, %s252_s7  }
  0x23   :  { %243 = dma.done.wait [#allocation3], 128  }
  0x24   :  { %244 = vsyncadd [#allocation3], 4294967168 }
  0x25   :  { %245 = dma.done.wait [#allocation6], 512  }
  0x26   :  { %246 = vsyncadd [#allocation6], 4294966784  ;;  %v253_v0 = vmov 0.0|0.0   ;;  %vm254_vm0 = vmmov 0   ;;  %v255_v1 = vmov 0.0   ;;  %v42_v2 = vld [vmem:[#allocation5] sm:$0xff] }
  0x27   :  { %163 = vmatprep.subr.bf16.mxu0 %v253_v0  ;;  %160 = vmatprep.mubr.msk.f32.mxu0 %vm254_vm0, %v255_v1  ;;  %v43_v3 = vld [vmem:[#allocation5 + $0x8] sm:$0xff]  ;;  %v44_v4 = vld [vmem:[#allocation5 + $0x10] sm:$0xff]  ;;  %v45_v6 = vld [vmem:[#allocation5 + $0x18] sm:$0xff]  ;;  %vm53_vm1 = vcmask 261120   ;;  %s256_s11 = smov [#allocation7]  }
  0x28   :  { %v164_v5 = vpack.c.bf16 %v43_v3, %v42_v2  ;;  %v167_v7 = vpack.c.bf16 %v45_v6, %v44_v4  ;;  %v41_v8 = vld [vmem:[#allocation2] sm:$0xff]  ;;  %s135_s12 = sshll.u32 %s256_s11, 4  ;;  %s136_s12 = int_to_ptr.vmem [resolvable:$true] %s135_s12 }
  0x29   :  { %v145_v9 = vld [vmem:[%s325_s2] ss:$0 sm:$0xff]  ;;  %s221_s13 = scalar_lea.vmem %s136_s12, 128  ;;  %p226_p3 = scmp.lt.s32.totalorder %s136_s12, %s136_s12 }
  0x2a   :  { %165 = vmatpush3.bf16.msra.mxu0 %v164_v5  ;;  %p222_p2 = scmp.ne.s32.totalorder %s136_s12, %s221_s13  ;;  %p227_p4 = scmp.lt.s32.totalorder %s221_s13, %s221_s13 }
  0x2b   :  { %166 = vmatprep.subr.bf16.mxu0 %v253_v0 }
  0x2c   :  { %p228_p5 = por %p227_p4, %p226_p3 }
  0x2e   :  { %168 = vmatpush3.bf16.msra.mxu0 %v167_v7  ;;  %p229_p6 = pnand %p228_p5, %p222_p2 }
  0x31   :  { %161 = vmatmul.mubr.msk.f32.vlgmr.msra.gmra.mrb[0].mxu0 %vm53_vm1, %v41_v8 }
 0x104   :  { %v123_v10 = vpop.f32.mrb[0].mxu0 }
 0x105   :  { %v124_v11 = vadd.f32 %v145_v9, %v123_v10  ;;  %v162_v12 = vpop.f32.mrb[1].mxu0 }
 0x107   :  { %v127_v13 = vmax.f32 %v124_v11, 0.0 }
 0x109   :  { %128 = vst [vmem:[#allocation7] sm:$0xff] %v127_v13 }
 0x10a   :  { %232 = shalt.err (!%p229_p6)
}
 0x10b   :  { %s233_s16 = scalar_lea.hbm %s326_s3, 128 }
 0x10c   :  { %p234_p7 = scmp.ne.s32.totalorder %s326_s3, %s233_s16  ;;  %p237_p8 = scmp.lt.u32.totalorder %s233_s16, %s326_s3 }
 0x10e   :  { %p239_p9 = pnand %p237_p8, %p234_p7 }
 0x110   :  { %242 = shalt.err (!%p239_p9)
}
 0x111   :  { %138 = dma.vmem_to_hbm [thread:$0]  %s136_s12, 128, %s326_s3, [#allocation4]  }
 0x112   :  { %247 = dma.done.wait [#allocation4], 128  }
 0x113   :  { %248 = vsyncadd [#allocation4], 4294967168 }
 0x114   :  { %142 = vsyncpa [#allocation3], 1 }
 0x115   :  { %143 = vsyncpa [#allocation6], 1 }
 0x116   :  { %144 = vsyncpa [#allocation4], 1 }

</bundles_post_ra>
